<compile_context>
chip_gen: v7x
topology: tpu7x:2x2x1
jax: 0.10.0
libtpu: 0.0.40
codegen_flags: <defaults>
</compile_context>

<pallas_src>
import jax
import jax.numpy as jnp
from jax.experimental import pallas as pl
from jax.experimental.pallas import tpu as pltpu


def _lensing_kernel(x_ref, defl_ref, o_ref):
    # x_ref:    (TR, H*W)  input tile
    # defl_ref: (1,  H*W)  precomputed deflection row (f32, VMEM-resident)
    # o_ref:    (TR, H*W)  output tile
    o_ref[...] = (x_ref[...] * defl_ref[...]).astype(o_ref.dtype)


def _deflection_map(theta_E, H, W):
    """theta_E**2 / (sqrt(xx^2 + yy^2) + 1e-6), flattened to (1, H*W), f32."""
    theta = jnp.asarray(theta_E, jnp.float32)
    y_coords = jnp.linspace(-1.0, 1.0, H, dtype=jnp.float32)
    x_coords = jnp.linspace(-1.0, 1.0, W, dtype=jnp.float32)
    yy, xx = jnp.meshgrid(y_coords, x_coords, indexing="ij")
    r = jnp.sqrt(xx * xx + yy * yy) + 1e-6
    return ((theta * theta) / r).reshape(1, H * W)


def _choose_row_block(rows, row_bytes, target_bytes=2 << 20):
    """Pick a row-block size: multiple of 8 sublanes, tile <= ~2 MiB,
    full-extent if the whole array is small, and (when tiling) at least two
    grid steps so both v7x TensorCores get fed."""
    tr = max(8, (target_bytes // max(row_bytes, 1)) // 8 * 8)
    if tr >= rows:
        return rows                      # single full-extent block (legal)
    half = max(8, (rows // 2) // 8 * 8)  # ensure >= 2 grid steps
    return min(tr, half)


def lensing_physics_layer(x, theta_E):
    """Pallas TPU implementation of LensingPhysicsLayer.forward.

    x: (B, C, H, W) array, theta_E: scalar parameter.
    Returns array of the same shape/dtype as x.
    """
    B, C, H, W = x.shape
    rows, cols = B * C, H * W

    x2 = x.reshape(rows, cols)
    defl = _deflection_map(theta_E, H, W)           # (1, cols) f32

    itemsize = jnp.dtype(x.dtype).itemsize
    tr = _choose_row_block(rows, cols * itemsize)
    grid = (pl.cdiv(rows, tr),)

    out2 = pl.pallas_call(
        _lensing_kernel,
        out_shape=jax.ShapeDtypeStruct((rows, cols), x.dtype),
        grid=grid,
        in_specs=[
            pl.BlockSpec((tr, cols), lambda i: (i, 0)),   # x row-block
            pl.BlockSpec((1, cols), lambda i: (0, 0)),    # deflection, resident
        ],
        out_specs=pl.BlockSpec((tr, cols), lambda i: (i, 0)),
        compiler_params=pltpu.CompilerParams(
            dimension_semantics=("parallel",)
        ),
    )(x2, defl)

    return out2.reshape(B, C, H, W)


def _reference(x, theta_E):
    B, C, H, W = x.shape
    y_coords = jnp.linspace(-1.0, 1.0, H)
    x_coords = jnp.linspace(-1.0, 1.0, W)
    yy, xx = jnp.meshgrid(y_coords, x_coords, indexing="ij")
    r = jnp.sqrt(xx ** 2 + yy ** 2) + 1e-6
    deflection = theta_E ** 2 / r
    return x * deflection[None, None, :, :]


if __name__ == "__main__":
    key = jax.random.PRNGKey(0)
    B, C, H, W = 2, 4, 16, 16
    x = jax.random.normal(key, (B, C, H, W), dtype=jnp.float32)

    # Deterministic parameter init (matches nn.Parameter(torch.tensor(1.0))).
    theta_E = jnp.float32(1.0)

    out = lensing_physics_layer(x, theta_E)
    out = jax.block_until_ready(out)

    ref = _reference(x, theta_E)
    assert out.shape == (B, C, H, W)
    assert out.dtype == x.dtype
    assert jnp.allclose(out, ref, rtol=1e-5, atol=1e-5)

    print("KERNEL_OK")
</pallas_src>

<mosaic_0001>
module attributes {stable_mosaic.version = 11 : i64} {
  func.func @_lensing_kernel(%arg0: i32, %arg1: memref<8x256xf32, #tpu.memory_space<vmem>>, %arg2: memref<1x256xf32, #tpu.memory_space<vmem>>, %arg3: memref<8x256xf32, #tpu.memory_space<vmem>>) attributes {dimension_semantics = [#tpu.dimension_semantics<parallel>], iteration_bounds = array<i64: 1>, scalar_prefetch = 0 : i64, scratch_operands = 0 : i64, tpu.core_type = #tpu.core_type<tc>, window_params = [{transform_indices = @transform_0, window_bounds = array<i64: 8, 256>}, {pipeline_mode = #tpu.pipeline_mode<synchronous>, transform_indices = @transform_1, window_bounds = array<i64: 1, 256>}, {transform_indices = @transform_2, window_bounds = array<i64: 8, 256>}]} {
    %c0 = arith.constant 0 : index
    %c0_0 = arith.constant 0 : index
    %0 = vector.load %arg1[%c0, %c0_0] : memref<8x256xf32, #tpu.memory_space<vmem>>, vector<8x256xf32>
    %c0_1 = arith.constant 0 : index
    %c0_2 = arith.constant 0 : index
    %1 = vector.load %arg2[%c0_1, %c0_2] : memref<1x256xf32, #tpu.memory_space<vmem>>, vector<1x256xf32>
    %2 = vector.broadcast %1 : vector<1x256xf32> to vector<8x256xf32>
    %3 = arith.mulf %0, %2 : vector<8x256xf32>
    %c0_3 = arith.constant 0 : index
    %c0_4 = arith.constant 0 : index
    %4 = vector.load %arg3[%c0_3, %c0_4] : memref<8x256xf32, #tpu.memory_space<vmem>>, vector<8x256xf32>
    tpu.vector_store %arg3[%c0_3, %c0_4], %3 {strides = array<i32>} : memref<8x256xf32, #tpu.memory_space<vmem>>, vector<8x256xf32>,
    return
  }
  func.func @transform_0(%arg0: i32) -> (i32, i32) {
    %c0_i32 = arith.constant 0 : i32
    %c0_i32_0 = arith.constant 0 : i32
    return %arg0, %c0_i32 : i32, i32
  }
  func.func @transform_1(%arg0: i32) -> (i32, i32) {
    %c0_i32 = arith.constant 0 : i32
    %c0_i32_0 = arith.constant 0 : i32
    %c0_i32_1 = arith.constant 0 : i32
    return %c0_i32, %c0_i32_0 : i32, i32
  }
  func.func @transform_2(%arg0: i32) -> (i32, i32) {
    %c0_i32 = arith.constant 0 : i32
    %c0_i32_0 = arith.constant 0 : i32
    return %arg0, %c0_i32 : i32, i32
  }
}

</mosaic_0001>

<bundles_post_ra>
// kernel: tpu_custom_call.1
= control target key start
LH: loop header
LB: loop body
LE: loop exit
PB: predicated region body
PF: predicated region fallthrough
CT: control target
= control target key end

     0   :  { %7 = vsyncpa [#allocation3], 0  ;;  %s151_s0 = inlined_call_operand.hbm [shape: f32[8,256], index: 0, kind: input, shape index: {}]   ;;  %s152_s1 = inlined_call_operand.vmem [shape: f32[1,256], index: 1, kind: input, shape index: {}]   ;;  %s153_s2 = inlined_call_operand.hbm [shape: f32[8,256], index: 2, kind: output, shape index: {}]  }
   0x1   :  { %8 = vsyncpa [#allocation4], 0  ;;  %s107_s9 = smov [#allocation2]   ;;  %s59_s13 = scalar_lea.hbm %s151_s0, 256 }
   0x2   :  { %s15_s10 = sshll.u32 %s107_s9, 4  ;;  %p60_p0 = scmp.ne.s32.totalorder %s151_s0, %s59_s13  ;;  %s16_s10 = int_to_ptr.vmem [resolvable:$true] %s15_s10 }
   0x3   :  { %p63_p1 = scmp.lt.u32.totalorder %s59_s13, %s151_s0 }
   0x5   :  { %p65_p2 = pnand %p63_p1, %p60_p0 }
   0x7   :  { %68 = shalt.err (!%p65_p2)
}
   0x8   :  { %s69_s18 = scalar_lea.vmem %s16_s10, 256  ;;  %p74_p4 = scmp.lt.s32.totalorder %s16_s10, %s16_s10 }
   0x9   :  { %p70_p3 = scmp.ne.s32.totalorder %s16_s10, %s69_s18  ;;  %p75_p5 = scmp.lt.s32.totalorder %s69_s18, %s69_s18 }
   0xb   :  { %p76_p6 = por %p75_p5, %p74_p4 }
   0xd   :  { %p77_p7 = pnand %p76_p6, %p70_p3 }
   0xf   :  { %80 = shalt.err (!%p77_p7)
}
  0x10   :  { %18 = dma.hbm_to_vmem [thread:$0]  %s151_s0, 256, %s16_s10, [#allocation3]  }
  0x11   :  { %103 = dma.done.wait [#allocation3], 256  }
  0x12   :  { %104 = vsyncadd [#allocation3], 4294967040  ;;  %v28_v0 = vlaneseq  ;;  %v24_v4 = vld [vmem:[#allocation2] sm:$0xff]  ;;  %v25_v6 = vld [vmem:[#allocation2 + $0x8] sm:$0xff]  ;;  %s108_s23 = smov [#allocation5]  }
  0x13   :  { %v26_v5 = vld [vmem:[%s152_s1] sm:$0x3]  ;;  %s48_s24 = sshll.u32 %s108_s23, 4  ;;  %s49_s24 = int_to_ptr.vmem [resolvable:$true] %s48_s24 }
  0x14   :  { %v29_v1 = vshrl.u32 %v28_v0, 7  ;;  %s81_s0 = scalar_lea.vmem %s49_s24, 256  ;;  %p86_p9 = scmp.lt.s32.totalorder %s49_s24, %s49_s24 }
  0x15   :  { %p82_p8 = scmp.ne.s32.totalorder %s49_s24, %s81_s0  ;;  %p87_p10 = scmp.lt.s32.totalorder %s81_s0, %s81_s0 }
  0x16   :  { %v30_v2 = vsub.s32 0, %v29_v1  ;;  %v34_v3 = vsub.s32 1, %v29_v1 }
  0x17   :  { %p88_p11 = por %p87_p10, %p86_p9 }
  0x18   :  { %v31_v7 = vrot.slane %v26_v5, %v30_v2  ;;  %v35_v8 = vrot.slane %v26_v5, %v34_v3 }
  0x19   :  { %p89_p12 = pnand %p88_p11, %p82_p8 }
  0x1a   :  { %v38_v9 = vmul.f32 %v31_v7, %v24_v4  ;;  %v39_v10 = vmul.f32 %v35_v8, %v25_v6 }
  0x1c   :  { %40 = vst [vmem:[#allocation5] sm:$0xff] %v38_v9  ;;  %41 = vst [vmem:[#allocation5 + $0x8] sm:$0xff] %v39_v10 }
  0x1d   :  { %92 = shalt.err (!%p89_p12)
}
  0x1e   :  { %s93_s1 = scalar_lea.hbm %s153_s2, 256 }
  0x1f   :  { %p94_p13 = scmp.ne.s32.totalorder %s153_s2, %s93_s1  ;;  %p97_p0 = scmp.lt.u32.totalorder %s93_s1, %s153_s2 }
  0x21   :  { %p99_p1 = pnand %p97_p0, %p94_p13 }
  0x23   :  { %102 = shalt.err (!%p99_p1)
}
  0x24   :  { %51 = dma.vmem_to_hbm [thread:$0]  %s49_s24, 256, %s153_s2, [#allocation4]  }
  0x25   :  { %105 = dma.done.wait [#allocation4], 256  }
  0x26   :  { %106 = vsyncadd [#allocation4], 4294967040 }
  0x27   :  { %55 = vsyncpa [#allocation3], 1 }
  0x28   :  { %56 = vsyncpa [#allocation4], 1 }

</bundles_post_ra>
